<compile_context>
chip_gen: v5e
topology: v5e:2x2
jax: 0.10.0
libtpu: 0.0.40
codegen_flags: <defaults>
</compile_context>

<pallas_src>
import functools
import math

import jax
import jax.numpy as jnp
from jax.experimental import pallas as pl
from jax.experimental.pallas import tpu as pltpu


def _sinusoidal_kernel(t_ref, o_ref, *, half_dim, log_scale):
    """t_ref: (tb, 1) float32 timesteps; o_ref: (tb, dim) embeddings."""
    tb, dim = o_ref.shape
    t = t_ref[...].astype(jnp.float32)                       # (tb, 1)

    # Column index over the full output width; columns >= half_dim reuse the
    # same frequency as (col - half_dim) but take cos instead of sin.
    col = jax.lax.broadcasted_iota(jnp.int32, (tb, dim), 1)  # (tb, dim)
    k = jnp.where(col < half_dim, col, col - half_dim).astype(jnp.float32)

    freqs = jnp.exp(-log_scale * k)                          # EUP exp
    arg = t * freqs                                          # broadcast (tb,1)*(tb,dim)

    out = jnp.where(col < half_dim, jnp.sin(arg), jnp.cos(arg))
    o_ref[...] = out.astype(o_ref.dtype)


def sinusoidal_position_embeddings(time, dim, *, block_b=1024):
    """time: (B,) float -> (B, dim) float32 sinusoidal embeddings."""
    B = time.shape[0]
    half_dim = dim // 2
    # Matches torch: log(10000) / (half_dim - 1)
    log_scale = math.log(10000.0) / (half_dim - 1)

    t2d = time.astype(jnp.float32).reshape(B, 1)

    tb = B if B <= block_b else block_b
    grid = (pl.cdiv(B, tb),)

    kernel = functools.partial(
        _sinusoidal_kernel, half_dim=half_dim, log_scale=log_scale)

    return pl.pallas_call(
        kernel,
        out_shape=jax.ShapeDtypeStruct((B, dim), jnp.float32),
        grid=grid,
        in_specs=[pl.BlockSpec((tb, 1), lambda i: (i, 0))],
        out_specs=pl.BlockSpec((tb, dim), lambda i: (i, 0)),
        compiler_params=pltpu.CompilerParams(
            dimension_semantics=("parallel",)),
    )(t2d)


def _reference(time, dim):
    """Pure-JAX port of the PyTorch forward, for correctness checking."""
    half = dim // 2
    emb = math.log(10000.0) / (half - 1)
    freqs = jnp.exp(jnp.arange(half, dtype=jnp.float32) * -emb)
    e = time.astype(jnp.float32)[:, None] * freqs[None, :]
    return jnp.concatenate([jnp.sin(e), jnp.cos(e)], axis=-1)


if __name__ == "__main__":
    B, DIM = 8, 128  # lane-dense output: dim == 128 lanes, B == 8 sublanes

    key = jax.random.PRNGKey(0)
    # Diffusion-style timesteps in [0, 1000).
    time = jax.random.uniform(key, (B,), jnp.float32, 0.0, 1000.0)

    out = sinusoidal_position_embeddings(time, DIM)
    out = jax.block_until_ready(out)

    ref = _reference(time, DIM)
    assert out.shape == (B, DIM)
    assert jnp.allclose(out, ref, atol=1e-5, rtol=1e-5), (
        float(jnp.max(jnp.abs(out - ref))))

    print("KERNEL_OK")
</pallas_src>

<mosaic_0001>
module attributes {stable_mosaic.version = 11 : i64} {
  func.func @_sinusoidal_kernel(%arg0: i32, %arg1: memref<8x1xf32, #tpu.memory_space<vmem>>, %arg2: memref<8x128xf32, #tpu.memory_space<vmem>>) attributes {dimension_semantics = [#tpu.dimension_semantics<parallel>], iteration_bounds = array<i64: 1>, scalar_prefetch = 0 : i64, scratch_operands = 0 : i64, tpu.core_type = #tpu.core_type<tc>, window_params = [{transform_indices = @transform_0, window_bounds = array<i64: 8, 1>}, {transform_indices = @transform_1, window_bounds = array<i64: 8, 128>}]} {
    %c0 = arith.constant 0 : index
    %c0_0 = arith.constant 0 : index
    %0 = vector.load %arg1[%c0, %c0_0] : memref<8x1xf32, #tpu.memory_space<vmem>>, vector<8x1xf32>
    %1 = tpu.iota {dimensions = array<i32: 1>} : vector<8x128xi32>
    %c64_i32 = arith.constant 64 : i32
    %2 = vector.broadcast %c64_i32 : i32 to vector<8x128xi32>
    %3 = arith.cmpi slt, %1, %2 : vector<8x128xi32>
    %c64_i32_1 = arith.constant 64 : i32
    %4 = vector.broadcast %c64_i32_1 : i32 to vector<8x128xi32>
    %5 = arith.subi %1, %4 : vector<8x128xi32>
    %6 = arith.select %3, %1, %5 : vector<8x128xi1>, vector<8x128xi32>
    %7 = arith.sitofp %6 : vector<8x128xi32> to vector<8x128xf32>
    %cst = arith.constant -0.146195874 : f32
    %8 = vector.broadcast %cst : f32 to vector<8x128xf32>
    %9 = arith.mulf %8, %7 : vector<8x128xf32>
    %10 = math.exp %9 : vector<8x128xf32>
    %11 = vector.broadcast %0 : vector<8x1xf32> to vector<8x128xf32>
    %12 = arith.mulf %11, %10 : vector<8x128xf32>
    %c64_i32_2 = arith.constant 64 : i32
    %13 = vector.broadcast %c64_i32_2 : i32 to vector<8x128xi32>
    %14 = arith.cmpi slt, %1, %13 : vector<8x128xi32>
    %15 = math.sin %12 : vector<8x128xf32>
    %16 = math.cos %12 : vector<8x128xf32>
    %17 = arith.select %14, %15, %16 : vector<8x128xi1>, vector<8x128xf32>
    %c0_3 = arith.constant 0 : index
    %c0_4 = arith.constant 0 : index
    %18 = vector.load %arg2[%c0_3, %c0_4] : memref<8x128xf32, #tpu.memory_space<vmem>>, vector<8x128xf32>
    tpu.vector_store %arg2[%c0_3, %c0_4], %17 {strides = array<i32>} : memref<8x128xf32, #tpu.memory_space<vmem>>, vector<8x128xf32>,
    return
  }
  func.func @transform_0(%arg0: i32) -> (i32, i32) {
    %c0_i32 = arith.constant 0 : i32
    %c0_i32_0 = arith.constant 0 : i32
    return %arg0, %c0_i32 : i32, i32
  }
  func.func @transform_1(%arg0: i32) -> (i32, i32) {
    %c0_i32 = arith.constant 0 : i32
    %c0_i32_0 = arith.constant 0 : i32
    return %arg0, %c0_i32 : i32, i32
  }
}

</mosaic_0001>

<bundles_post_ra>
// kernel: tpu_custom_call.1
= control target key start
LH: loop header
LB: loop body
LE: loop exit
PB: predicated region body
PF: predicated region fallthrough
CT: control target
= control target key end

     0   :  { %v396_v1 = vmov 0   ;;  %s490_s0 = inlined_call_operand.vmem [shape: f32[8,1], index: 0, kind: input, shape index: {}]   ;;  %s491_s1 = inlined_call_operand.hbm [shape: f32[8,128], index: 1, kind: output, shape index: {}]  }
   0x1   :  { %v9_v0 = vld [vmem:[%s490_s0] sm:$0xff]  ;;  %367 = vset.pattern.permute.xlu0 %v396_v1 }
   0x2   :  { %21 = vperm.xlu0 %367, %v9_v0  }
   0x3   :  { %6 = vsyncpa [#allocation3], 0  ;;  %v10_v2 = vlaneseq  ;;  %v397_v23 = vmov 683565275   ;;  %v398_v25 = vmov 2475754826  }
   0x4   :  { %v399_v28 = vmov 2131351028   ;;  %v400_v31 = vmov 2102212464   ;;  %v401_v34 = vmov 920167782  }
   0x5   :  { %v418_v3 = vand.u32 127, %v10_v2  ;;  %v402_v37 = vmov 1326507024   ;;  %s403_s0 = smov [#allocation2]   ;;  %s343_s11 = sshll.u32 %s491_s1, 4  ;;  %s344_s11 = int_to_ptr.hbm [resolvable:$true] %s343_s11 }
   0x6   :  { %s341_s8 = sshll.u32 %s403_s0, 4  ;;  %s342_s8 = int_to_ptr.vmem [resolvable:$true] %s341_s8 }
   0x7   :  { %v352_v4 = vadd.s32 4294967232, %v418_v3  ;;  %vm12_vm0 = vcmp.lt.s32.totalorder %v418_v3, 64 }
   0x9   :  { %v14_v5 = vsel %vm12_vm0, %v418_v3, %v352_v4 }
   0xa   :  { %v15_v6 = vcvt.s32.f32 %v14_v5 }
   0xc   :  { %v16_v7 = vmul.f32 -0.14619587, %v15_v6 }
   0xe   :  { %v17_v8 = vmul.f32 1.442695, %v16_v7 }
  0x10   :  { %368 = vpow2.f32 %v17_v8 }
  0x16   :  { %v369_v9 = vpop.eup %368 }
  0x74   :  { %v22_v10 = vpop.permute.xlu0 %21 }
  0x75   :  { %v425_v11 = vmul.f32 %v369_v9, %v22_v10 }
  0x77   :  { %v28_v12 = vand.u32 2139095040, %v425_v11  ;;  %v25_v15 = vand.u32 2147483647, %v425_v11  ;;  %vm27_vm13 = vcmp.lt.s32.totalorder %v425_v11, 0 }
  0x79   :  { %v29_v13 = vshrl.u32 %v28_v12, 23  ;;  %v32_v17 = vand.u32 8388607, %v25_v15  ;;  %vm26_vm14 = vcmp.le.f32.partialorder %v25_v15, 0.7853982 }
  0x7b   :  { %v353_v14 = vadd.s32 4294967169, %v29_v13  ;;  %v33_v21 = vor.u32 8388608, %v32_v17 }
  0x7d   :  { %v35_v16 = vadd.s32 1, %v353_v14  ;;  %v442_v44 = vshll.u32 %v33_v21, 8 }
  0x7f   :  { %vm36_vm1 = vcmp.gt.s32.totalorder %v35_v16, 0  ;;  %v74_v53 = vand.u32 65535, %v442_v44  ;;  %v75_v54 = vshrl.u32 %v442_v44, 16 }
  0x80   :  { %v37_v18 = vsel %vm36_vm1, %v35_v16, 0 }
  0x81   :  { %v39_v19 = vand.u32 31, %v37_v18  ;;  %v433_v22 = vshrl.u32 %v37_v18, 5 }
  0x83   :  { %v431_v20 = vsub.s32 32, %v39_v19  ;;  %v42_v24 = vshll.u32 %v397_v23, %v39_v19  ;;  %v45_v26 = vshll.u32 %v398_v25, %v39_v19  ;;  %v48_v30 = vshll.u32 %v399_v28, %v39_v19 }
  0x84   :  { %v51_v33 = vshll.u32 %v400_v31, %v39_v19  ;;  %v54_v36 = vshll.u32 %v401_v34, %v39_v19  ;;  %vm57_vm2 = vcmp.lt.s32.totalorder %v433_v22, 1  ;;  %vm60_vm3 = vcmp.lt.s32.totalorder %v433_v22, 4 }
  0x85   :  { %v43_v27 = vshrl.u32 %v398_v25, %v431_v20  ;;  %v46_v29 = vshrl.u32 %v399_v28, %v431_v20  ;;  %v49_v32 = vshrl.u32 %v400_v31, %v431_v20  ;;  %v52_v35 = vshrl.u32 %v401_v34, %v431_v20 }
  0x86   :  { %v55_v38 = vshrl.u32 %v402_v37, %v431_v20  ;;  %vm59_vm4 = vcmp.lt.s32.totalorder %v433_v22, 3  ;;  %vm58_vm5 = vcmp.lt.s32.totalorder %v433_v22, 2  ;;  %v41_v19 = vshrl.u32 %v397_v23, %v431_v20 }
  0x87   :  { %v44_v39 = vor.u32 %v43_v27, %v42_v24  ;;  %v47_v40 = vor.u32 %v46_v29, %v45_v26  ;;  %v50_v41 = vor.u32 %v49_v32, %v48_v30  ;;  %v53_v42 = vor.u32 %v52_v35, %v51_v33 }
  0x88   :  { %v56_v43 = vor.u32 %v55_v38, %v54_v36 }
  0x89   :  { %v65_v45 = vsel %vm57_vm2, %v44_v39, %v47_v40  ;;  %v69_v46 = vsel %vm57_vm2, %v47_v40, %v50_v41  ;;  %v66_v47 = vsel %vm60_vm3, %v53_v42, 920167782  ;;  %v62_v16 = vsel %vm60_vm3, %v50_v41, 2102212464 }
  0x8a   :  { %v70_v48 = vsel %vm60_vm3, %v56_v43, 1326507024  ;;  %v67_v49 = vsel %vm59_vm4, %v50_v41, %v66_v47  ;;  %v61_v28 = vsel %vm57_vm2, %v41_v19, %v44_v39  ;;  %v63_v29 = vsel %vm59_vm4, %v47_v40, %v62_v16 }
  0x8b   :  { %v71_v50 = vsel %vm59_vm4, %v53_v42, %v70_v48  ;;  %v68_v51 = vsel %vm58_vm5, %v65_v45, %v67_v49  ;;  %v64_v20 = vsel %vm58_vm5, %v61_v28, %v63_v29 }
  0x8c   :  { %v72_v52 = vsel %vm58_vm5, %v69_v46, %v71_v50  ;;  %v98_v57 = vand.u32 65535, %v68_v51  ;;  %v99_v58 = vshrl.u32 %v68_v51, 16  ;;  %v118_v36 = vmul.u32 %v442_v44, %v64_v20 }
  0x8d   :  { %v76_v55 = vand.u32 65535, %v72_v52  ;;  %v77_v56 = vshrl.u32 %v72_v52, 16 }
  0x8e   :  { %v101_v61 = vmul.u32 %v99_v58, %v74_v53  ;;  %v102_v62 = vmul.u32 %v98_v57, %v75_v54  ;;  %v100_v4 = vmul.u32 %v98_v57, %v74_v53  ;;  %v103_v8 = vmul.u32 %v99_v58, %v75_v54 }
  0x8f   :  { %v79_v59 = vmul.u32 %v77_v56, %v74_v53  ;;  %v80_v60 = vmul.u32 %v76_v55, %v75_v54  ;;  %v78_v63 = vmul.u32 %v76_v55, %v74_v53  ;;  %v81_v2 = vmul.u32 %v77_v56, %v75_v54 }
  0x90   :  { %v104_v5 = vshll.u32 %v101_v61, 16  ;;  %v106_v10 = vshll.u32 %v102_v62, 16  ;;  %v105_v26 = vshrl.u32 %v101_v61, 16  ;;  %v107_v32 = vshrl.u32 %v102_v62, 16 }
  0x91   :  { %v82_v0 = vshll.u32 %v79_v59, 16  ;;  %v84_v6 = vshll.u32 %v80_v60, 16  ;;  %v83_v21 = vshrl.u32 %v79_v59, 16  ;;  %v85_v30 = vshrl.u32 %v80_v60, 16 }
  0x92   :  { %vm108_vm7 = vc.u32 %v100_v4, %v104_v5  ;;  %v110_v12 = vadd.s32 %v104_v5, %v100_v4 }
  0x93   :  { %vm86_vm6 = vc.u32 %v78_v63, %v82_v0  ;;  %v88_v7 = vadd.s32 %v82_v0, %v78_v63  ;;  %v109_v14 = vsel %vm108_vm7, 1, %v396_v1 }
  0x94   :  { %v87_v9 = vsel %vm86_vm6, 1, %v396_v1  ;;  %v111_v18 = vadd.s32 %v109_v14, %v103_v8  ;;  %vm112_vm9 = vc.u32 %v110_v12, %v106_v10  ;;  %v114_v35 = vadd.s32 %v110_v12, %v106_v10 }
  0x95   :  { %v89_v13 = vadd.s32 %v87_v9, %v81_v2  ;;  %vm90_vm8 = vc.u32 %v88_v7, %v84_v6  ;;  %v113_v25 = vsel %vm112_vm9, 1, %v396_v1  ;;  %vm168_vm6 = vweird.f32 %v425_v11 }
  0x96   :  { %v91_v17 = vsel %vm90_vm8, 1, %v396_v1  ;;  %v115_v27 = vadd.s32 %v113_v25, %v111_v18 }
  0x97   :  { %v93_v24 = vadd.s32 %v91_v17, %v89_v13 }
  0x98   :  { %v116_v33 = vadd.s32 %v115_v27, %v105_v26 }
  0x99   :  { %v94_v31 = vadd.s32 %v93_v24, %v83_v21 }
  0x9a   :  { %v117_v23 = vadd.s32 %v116_v33, %v107_v32 }
  0x9b   :  { %v95_v34 = vadd.s32 %v94_v31, %v85_v30 }
  0x9c   :  { %v121_v1 = vadd.s32 1, %v117_v23 }
  0x9d   :  { %vm120_vm10 = vc.u32 %v95_v34, %v114_v35  ;;  %v119_v22 = vadd.s32 %v114_v35, %v95_v34 }
  0x9e   :  { %v122_v37 = vsel %vm120_vm10, %v121_v1, %v117_v23 }
  0x9f   :  { %v123_v38 = vadd.s32 %v122_v37, %v118_v36 }
  0xa1   :  { %v124_v39 = vadd.s32 536870912, %v123_v38 }
  0xa3   :  { %v125_v41 = vshrl.u32 %v124_v39, 30 }
  0xa5   :  { %v126_v42 = vshll.u32 %v125_v41, 30  ;;  %v149_v61 = vsub.s32 4, %v125_v41 }
  0xa7   :  { %v127_v40 = vsub.s32 %v123_v38, %v126_v42  ;;  %v150_v4 = vsel %vm27_vm13, %v149_v61, %v125_v41 }
  0xa8   :  { %v152_v7 = vsel %vm26_vm14, 0, %v150_v4 }
  0xa9   :  { %vm128_vm11 = vcmp.lt.s32.totalorder %v127_v40, 0  ;;  %v129_v43 = vsub.s32 0, %v127_v40  ;;  %v169_v13 = vadd.s32 3, %v152_v7  ;;  %v324_v18 = vand.u32 3, %v152_v7 }
  0xab   :  { %v130_v45 = vsel %vm128_vm11, %v129_v43, %v127_v40  ;;  %v170_v19 = vand.u32 3, %v169_v13  ;;  %vm325_vm15 = vcmp.lt.s32.totalorder %v324_v18, 2  ;;  %vm326_vm1 = vcmp.eq.s32.totalorder %v324_v18, 0 }
  0xac   :  { %v131_v46 = vclz %v130_v45  ;;  %vm329_vm5 = vcmp.eq.s32.totalorder %v324_v18, 2 }
  0xad   :  { %vm171_vm2 = vcmp.lt.s32.totalorder %v170_v19, 2  ;;  %vm172_vm3 = vcmp.eq.s32.totalorder %v170_v19, 0  ;;  %vm175_vm4 = vcmp.eq.s32.totalorder %v170_v19, 2 }
  0xae   :  { %v354_v47 = vadd.s32 4294967294, %v131_v46 }
  0xb0   :  { %vm355_vm12 = vcmp.lt.s32.totalorder %v354_v47, 0 }
  0xb1   :  { %v134_v48 = vsel %vm355_vm12, 0, %v354_v47 }
  0xb2   :  { %v135_v49 = vsub.s32 32, %v134_v48  ;;  %v139_v50 = vsub.s32 4294967266, %v134_v48  ;;  %v136_v51 = vshll.u32 %v127_v40, %v134_v48 }
  0xb4   :  { %v137_v52 = vshrl.u32 %v119_v22, %v135_v49  ;;  %v140_v53 = vadd.s32 127, %v139_v50 }
  0xb6   :  { %v138_v44 = vor.u32 %v137_v52, %v136_v51  ;;  %v141_v54 = vshll.u32 %v140_v53, 23 }
  0xb8   :  { %v142_v55 = vor.u32 4788187, %v141_v54  ;;  %v145_v57 = vcvt.s32.f32 %v138_v44 }
  0xba   :  { %v143_v56 = vand.u32 2147483647, %v142_v55 }
  0xbc   :  { %v146_v58 = vmul.f32 %v145_v57, %v143_v56 }
  0xbe   :  { %v147_v59 = vxor.u32 2147483648, %v146_v58 }
  0xc0   :  { %v148_v60 = vsel %vm27_vm13, %v147_v59, %v146_v58 }
  0xc1   :  { %v151_v62 = vsel %vm26_vm14, %v425_v11, %v148_v60 }
  0xc2   :  { %v153_v63 = vmul.f32 %v151_v62, %v151_v62 }
  0xc4   :  { %v154_v0 = vmul.f32 -0.001358992, %v153_v63  ;;  %v161_v2 = vmul.f32 -0.00019511016, %v153_v63 }
  0xc6   :  { %v155_v5 = vadd.f32 0.041655596, %v154_v0  ;;  %v162_v6 = vadd.f32 0.008332121, %v161_v2 }
  0xc8   :  { %v156_v8 = vmul.f32 %v155_v5, %v153_v63  ;;  %v163_v9 = vmul.f32 %v162_v6, %v153_v63 }
  0xca   :  { %v157_v10 = vadd.f32 -0.4999988, %v156_v8  ;;  %v164_v12 = vadd.f32 -0.16666654, %v163_v9 }
  0xcc   :  { %v158_v14 = vmul.f32 %v157_v10, %v153_v63  ;;  %v165_v16 = vmul.f32 %v164_v12, %v153_v63 }
  0xce   :  { %v159_v17 = vadd.f32 1.0, %v158_v14  ;;  %v166_v15 = vadd.f32 1.0, %v165_v16 }
  0xd0   :  { %v167_v21 = vmul.f32 %v166_v15, %v151_v62  ;;  %v176_v24 = vxor.u32 2147483648, %v159_v17 }
  0xd2   :  { %v173_v25 = vxor.u32 2147483648, %v167_v21  ;;  %v177_v27 = vsel %vm175_vm4, %v176_v24, %v167_v21  ;;  %v331_v29 = vsel %vm329_vm5, %v176_v24, %v167_v21 }
  0xd4   :  { %v174_v26 = vsel %vm172_vm3, %v159_v17, %v173_v25  ;;  %v328_v28 = vsel %vm326_vm1, %v159_v17, %v173_v25 }
  0xd5   :  { %v178_v30 = vsel %vm171_vm2, %v174_v26, %v177_v27  ;;  %v332_v31 = vsel %vm325_vm15, %v328_v28, %v331_v29 }
  0xd6   :  { %v179_v32 = vsel %vm168_vm6, nan, %v178_v30  ;;  %v333_v33 = vsel %vm168_vm6, nan, %v332_v31 }
  0xd7   :  { %v334_v34 = vsel %vm12_vm0, %v179_v32, %v333_v33 }
  0xd8   :  { %335 = vst [vmem:[#allocation2] sm:$0xff] %v334_v34 }
  0xd9   :  { %346 = dma.vmem_to_hbm [thread:$0]  %s342_s8, 128, %s344_s11, [#allocation3]  }
  0xda   :  { %394 = dma.done.wait [#allocation3], 128  }
  0xdb   :  { %395 = vsyncadd [#allocation3], 4294967168 }
  0xdc   :  { %351 = vsyncpa [#allocation3], 1 }

</bundles_post_ra>
